<compile_context>
chip_gen: v7x
topology: tpu7x:2x2x1
jax: 0.10.0
libtpu: 0.0.40
codegen_flags: <defaults>
</compile_context>

<pallas_src>
import functools
import math

import jax
import jax.numpy as jnp
import numpy as np
from jax.experimental import pallas as pl
from jax.experimental.pallas import tpu as pltpu


# ----------------------------------------------------------------------------
# Tiling helpers (avoid whole-buffer jnp.pad: pick tiles that divide M exactly)
# ----------------------------------------------------------------------------
def _pick_tile(n, target, multiple=16):
    """Largest divisor of n that is <= target and a multiple of `multiple`.
    Falls back to n itself (single full block -> always layout-legal)."""
    top = min(n, max(multiple, int(target)))
    for d in range(top, 0, -1):
        if n % d == 0 and d % multiple == 0:
            return d
    return n


# ----------------------------------------------------------------------------
# Kernel 1: matmul + bias (+ReLU)  -- used only for the small 5x5 first layer
# ----------------------------------------------------------------------------
def _mm_bias_kernel(a_ref, w_ref, b_ref, o_ref, *, relu):
    y = jnp.dot(a_ref[...], w_ref[...], preferred_element_type=jnp.float32)
    y = y + b_ref[...]
    if relu:
        y = jnp.maximum(y, 0.0)
    o_ref[...] = y.astype(o_ref.dtype)


def pallas_matmul_bias(a, w, bias, relu=False, out_dtype=jnp.bfloat16,
                       target_m=512):
    """a: [M, K] bf16, w: [K, N] bf16, bias: [N] f32 -> [M, N] out_dtype."""
    M, K = a.shape
    K2, N = w.shape
    assert K == K2
    tile_m = _pick_tile(M, target_m)
    return pl.pallas_call(
        functools.partial(_mm_bias_kernel, relu=relu),
        out_shape=jax.ShapeDtypeStruct((M, N), out_dtype),
        grid=(M // tile_m,),
        in_specs=[
            pl.BlockSpec((tile_m, K), lambda i: (i, 0)),
            pl.BlockSpec((K, N), lambda i: (0, 0)),
            pl.BlockSpec((1, N), lambda i: (0, 0)),
        ],
        out_specs=pl.BlockSpec((tile_m, N), lambda i: (i, 0)),
        compiler_params=pltpu.CompilerParams(
            dimension_semantics=("parallel",)),
    )(a, w, bias.reshape(1, N).astype(jnp.float32))


# ----------------------------------------------------------------------------
# Kernel 2: fused 3x3 conv (halo-row manual DMA, 9 shifted matmuls in VMEM),
#           optional fused residual add.  No HBM im2col.
# ----------------------------------------------------------------------------
def _conv3x3_kernel(*refs, tile_h, W, cin, cout, relu, has_res):
    if has_res:
        x_hbm, w_ref, b_ref, res_ref, o_ref, xbuf, sem = refs
    else:
        x_hbm, w_ref, b_ref, o_ref, xbuf, sem = refs
        res_ref = None

    b = pl.program_id(0)
    r = pl.program_id(1)
    row0 = pl.multiple_of(r * tile_h, tile_h)
    # DMA the (tile_h + 2)-row halo slab of the pre-padded image into VMEM.
    cp = pltpu.make_async_copy(x_hbm.at[b, pl.ds(row0, tile_h + 2)],
                               xbuf, sem.at[0])
    cp.start()
    cp.wait()

    rows = tile_h * W
    acc = jnp.zeros((rows, cout), jnp.float32)
    for di in range(3):                              # static unroll: 9 taps
        for dj in range(3):
            patch = xbuf[di:di + tile_h, dj:dj + W, :].reshape(rows, cin)
            acc = acc + jnp.dot(patch, w_ref[di * 3 + dj],
                                preferred_element_type=jnp.float32)
    acc = acc + b_ref[...]
    if relu:
        acc = jnp.maximum(acc, 0.0)
    if has_res:                                      # fused residual add
        acc = acc + res_ref[...].astype(jnp.float32)
    o_ref[...] = acc.astype(o_ref.dtype)


def pallas_conv3x3(x_pad, w9, bias, residual=None, relu=False,
                   out_dtype=jnp.bfloat16, target_rows=1024):
    """3x3 'same' conv over an NHWC image already zero-padded by 1 on H and W.
      x_pad:    [B, H+2, W+2, cin]  bf16 (HBM, halo tiles DMA'd manually)
      w9:       [9, cin, cout]      bf16 (row-major 3x3 taps)
      bias:     [cout]              f32
      residual: optional [B*H*W, cout] added to the conv output (fused h + r)
    Returns [B*H*W, cout] (pixel-flattened, row-major)."""
    B, Hp, Wp, cin = x_pad.shape
    H, W = Hp - 2, Wp - 2
    _, cin2, cout = w9.shape
    assert cin2 == cin

    # Row-tile height: divides H, keeps (tile_h * W) sublane-aligned, and keeps
    # halo read-amplification (tile_h+2)/tile_h small.
    tile_h = None
    for d in range(min(H, max(1, target_rows // max(W, 1))), 0, -1):
        if H % d == 0 and (d * W) % 16 == 0:
            tile_h = d
            break
    assert tile_h is not None, "need (tile_h * W) % 16 == 0 for block layout"
    nrt = H // tile_h
    rows = tile_h * W
    M = B * H * W

    in_specs = [
        pl.BlockSpec(memory_space=pl.ANY),                       # halo source
        pl.BlockSpec((9, cin, cout), lambda b, r: (0, 0, 0)),    # weights (resident)
        pl.BlockSpec((1, cout), lambda b, r: (0, 0)),            # bias
    ]
    args = [x_pad, w9, bias.reshape(1, cout).astype(jnp.float32)]
    if residual is not None:
        in_specs.append(
            pl.BlockSpec((rows, cout), lambda b, r: (b * nrt + r, 0)))
        args.append(residual)

    return pl.pallas_call(
        functools.partial(_conv3x3_kernel, tile_h=tile_h, W=W, cin=cin,
                          cout=cout, relu=relu,
                          has_res=residual is not None),
        out_shape=jax.ShapeDtypeStruct((M, cout), out_dtype),
        grid=(B, nrt),
        in_specs=in_specs,
        out_specs=pl.BlockSpec((rows, cout), lambda b, r: (b * nrt + r, 0)),
        scratch_shapes=[
            pltpu.VMEM((tile_h + 2, Wp, cin), x_pad.dtype),
            pltpu.SemaphoreType.DMA((1,)),
        ],
        compiler_params=pltpu.CompilerParams(
            dimension_semantics=("parallel", "parallel")),
    )(*args)


# ----------------------------------------------------------------------------
# Kernel 3: fused head = 1x1 conv (MXU) + discretized logistic mixture PMF
# ----------------------------------------------------------------------------
def _head_pmf_kernel(h_ref, w_ref, b_ref, o_ref, *, num_mix, lower, num_sym):
    rows = h_ref.shape[0]
    L = num_sym

    # 1x1 conv to mixture params, in-VMEM (no [M, 3*num_mix] HBM round trip)
    p = jnp.dot(h_ref[...], w_ref[...],
                preferred_element_type=jnp.float32) + b_ref[...]
    logits = p[:, 0:num_mix]
    means = p[:, num_mix:2 * num_mix]
    log_scales = jnp.maximum(p[:, 2 * num_mix:3 * num_mix], -7.0)

    # softmax over mixture components (approx reciprocal -> EUP slot)
    mmax = jnp.max(logits, axis=1, keepdims=True)
    e = jnp.exp(logits - mmax)
    weights = e * pl.reciprocal(jnp.sum(e, axis=1, keepdims=True), approx=True)

    # labels generated in-kernel; boundary-CDF trick: one sigmoid per bin edge
    col = jax.lax.broadcasted_iota(jnp.int32, (rows, L), 1)
    lo_edge = col.astype(jnp.float32) + (lower - 0.5)   # lower edge of symbol j

    cdf_lo = jnp.zeros((rows, L), jnp.float32)          # sum_k w_k * sigmoid(.)
    for k in range(num_mix):                            # static unroll
        mu = means[:, k:k + 1]
        inv_s = jnp.exp(-log_scales[:, k:k + 1])
        cdf_lo = cdf_lo + weights[:, k:k + 1] * jax.nn.sigmoid(
            (lo_edge - mu) * inv_s)

    # pmf_j = cdf(upper edge_j) - cdf(lower edge_j); upper edge_j = lower edge_{j+1}
    # Edge handling hoisted out of the mixture loop: j==L-1 -> 1, j==0 -> 0.
    cdf_hi = jnp.concatenate(
        [cdf_lo[:, 1:], jnp.ones((rows, 1), jnp.float32)], axis=1)
    cdf_lo = jnp.where(col == 0, 0.0, cdf_lo)
    o_ref[...] = jnp.maximum(cdf_hi - cdf_lo, 1e-9)


def pallas_head_pmf(h, w_out, b_out, lower_bound, num_sym, num_mix=3,
                    target_p=256):
    """h: [M, nec] bf16, w_out: [nec, 3*num_mix] bf16, b_out: [3*num_mix] f32
    -> pmf [M, num_sym] f32 over symbols lower_bound .. lower_bound+num_sym-1."""
    M, nec = h.shape
    tile_p = _pick_tile(M, target_p)
    return pl.pallas_call(
        functools.partial(_head_pmf_kernel, num_mix=num_mix,
                          lower=float(lower_bound), num_sym=int(num_sym)),
        out_shape=jax.ShapeDtypeStruct((M, num_sym), jnp.float32),
        grid=(M // tile_p,),
        in_specs=[
            pl.BlockSpec((tile_p, nec), lambda i: (i, 0)),
            pl.BlockSpec((nec, 3 * num_mix), lambda i: (0, 0)),
            pl.BlockSpec((1, 3 * num_mix), lambda i: (0, 0)),
        ],
        out_specs=pl.BlockSpec((tile_p, num_sym), lambda i: (i, 0)),
        compiler_params=pltpu.CompilerParams(
            dimension_semantics=("parallel",)),
    )(h, w_out, b_out.reshape(1, 3 * num_mix).astype(jnp.float32))


# ----------------------------------------------------------------------------
# Glue: im2col (first layer only), masked-conv weights, parameter init
# ----------------------------------------------------------------------------
def im2col(x_nhwc, k, pad):
    """x: [B,H,W,C] -> [B*H*W, k*k*C] (tap-major, channel-minor), 'same' conv."""
    B, H, W, C = x_nhwc.shape
    xp = jnp.pad(x_nhwc, ((0, 0), (pad, pad), (pad, pad), (0, 0)))
    taps = [xp[:, i:i + H, j:j + W, :] for i in range(k) for j in range(k)]
    patches = jnp.stack(taps, axis=3)                 # [B,H,W,k*k,C]
    return patches.reshape(B * H * W, k * k * C)


def conv_mask(k, mask_type):
    """PixelCNN raster-scan causal mask ('A' excludes center, 'B' includes it)."""
    m = np.zeros((k, k), np.float32)
    c = k // 2
    m[:c, :] = 1.0
    m[c, :c] = 1.0
    if mask_type == "B":
        m[c, c] = 1.0
    return jnp.asarray(m)


def init_pixelcnn_context_params(key, context_ch, nec, num_mix=3):
    ks = jax.random.split(key, 4)

    def winit(k, shape, fan_in):
        return jax.random.normal(k, shape, jnp.float32) / math.sqrt(fan_in)

    cin0 = 1 + context_ch
    # first layer: masked-'A' 5x5 on the LH channel fused with plain 5x5 on context
    w_in = winit(ks[0], (5, 5, cin0, nec), 25 * cin0)
    chan_mask = jnp.concatenate(
        [conv_mask(5, "A")[:, :, None, None],
         jnp.ones((5, 5, context_ch, 1), jnp.float32)], axis=2)
    w_in = (w_in * chan_mask).reshape(25 * cin0, nec)
    k_pad = -(-w_in.shape[0] // 8) * 8               # 75 -> 80: clean sublanes
    w_in = jnp.pad(w_in, ((0, k_pad - w_in.shape[0]), (0, 0)))

    def masked_b3(k):
        w = winit(k, (3, 3, nec, nec), 9 * nec) * conv_mask(3, "B")[:, :, None, None]
        return w.reshape(9, nec, nec).astype(jnp.bfloat16)

    return {
        "w_in": w_in.astype(jnp.bfloat16),            # [K_pad, nec]
        "b_in": jnp.zeros((nec,), jnp.float32),
        "w_r1": masked_b3(ks[1]),                     # [9, nec, nec]
        "b_r1": jnp.zeros((nec,), jnp.float32),
        "w_r2": masked_b3(ks[2]),
        "b_r2": jnp.zeros((nec,), jnp.float32),
        "w_out": winit(ks[3], (nec, 3 * num_mix), nec).astype(jnp.bfloat16),
        "b_out": jnp.zeros((3 * num_mix,), jnp.float32),
    }


def init_coding_lh_lossless(key, decomp_levels, nec, context_ch=2, num_mix=3):
    keys = jax.random.split(key, decomp_levels)
    return [init_pixelcnn_context_params(k, context_ch, nec, num_mix)
            for k in keys]


# ----------------------------------------------------------------------------
# Forward pass (== CodingLH_lossless.forward -> PixelCNN_Context.forward_inf)
# ----------------------------------------------------------------------------
def coding_lh_lossless_forward(LH, context, lower_bound, upper_bound, layer,
                               all_params, num_mix=3):
    """LH: [B,1,H,W], context: [B,2,H,W] (NCHW, like PyTorch).
    Returns per-pixel PMF over integer symbols in [lower_bound, upper_bound],
    shaped [B, H, W, L] with L = upper_bound - lower_bound + 1."""
    p = all_params[layer]
    B, _, H, W = LH.shape
    nec = p["w_r1"].shape[-1]
    L = int(upper_bound) - int(lower_bound) + 1

    x0 = jnp.concatenate([LH, context], axis=1)                   # [B,3,H,W]
    x0 = jnp.transpose(x0, (0, 2, 3, 1)).astype(jnp.bfloat16)     # NHWC

    # --- fused first layer: relu(maskA_conv5(LH) + conv5(ctx)) via im2col+matmul
    a = im2col(x0, 5, 2)                                          # [M, 75]
    a = jnp.pad(a, ((0, 0), (0, p["w_in"].shape[0] - a.shape[1])))
    h = pallas_matmul_bias(a, p["w_in"], p["b_in"], relu=True)    # [M, nec] bf16

    # --- masked-'B' residual block: two fused 3x3 convs (halo DMA, no HBM im2col)
    h_pad = jnp.pad(h.reshape(B, H, W, nec),
                    ((0, 0), (1, 1), (1, 1), (0, 0)))
    t = pallas_conv3x3(h_pad, p["w_r1"], p["b_r1"], relu=True)    # [M, nec]
    t_pad = jnp.pad(t.reshape(B, H, W, nec),
                    ((0, 0), (1, 1), (1, 1), (0, 0)))
    h2 = pallas_conv3x3(t_pad, p["w_r2"], p["b_r2"], residual=h,  # h + r fused
                        relu=False)                               # [M, nec]

    # --- fused head: 1x1 conv to mixture params + discretized logistic PMF
    prob = pallas_head_pmf(h2, p["w_out"], p["b_out"], lower_bound, L,
                           num_mix=num_mix)                       # [M, L] f32
    return prob.reshape(B, H, W, L)


# ----------------------------------------------------------------------------
# Demo
# ----------------------------------------------------------------------------
if __name__ == "__main__":
    key = jax.random.PRNGKey(0)
    k_params, k_lh, k_ctx = jax.random.split(key, 3)

    decomp_levels = 3
    nec = 32                       # internal channels (small demo size)
    B, H, W = 2, 16, 16
    lower_bound, upper_bound = -8, 8
    layer = 1

    all_params = init_coding_lh_lossless(k_params, decomp_levels, nec)

    LH = jnp.round(jax.random.normal(k_lh, (B, 1, H, W)) * 3.0)
    context = jax.random.normal(k_ctx, (B, 2, H, W))

    prob = coding_lh_lossless_forward(LH, context, lower_bound, upper_bound,
                                      layer, all_params)
    prob = jax.block_until_ready(prob)

    L = upper_bound - lower_bound + 1
    assert prob.shape == (B, H, W, L)
    assert bool(jnp.all(jnp.isfinite(prob)))
    assert bool(jnp.all(prob > 0.0))
    # PMF over the full coding range telescopes to 1 by construction
    assert bool(jnp.all(jnp.abs(jnp.sum(prob, axis=-1) - 1.0) < 1e-2))
    print("KERNEL_OK")
</pallas_src>

<mosaic_0001>
module attributes {stable_mosaic.version = 11 : i64} {
  func.func @_mm_bias_kernel(%arg0: i32, %arg1: memref<512x80xbf16, #tpu.memory_space<vmem>>, %arg2: memref<80x32xbf16, #tpu.memory_space<vmem>>, %arg3: memref<1x32xf32, #tpu.memory_space<vmem>>, %arg4: memref<512x32xbf16, #tpu.memory_space<vmem>>) attributes {dimension_semantics = [#tpu.dimension_semantics<parallel>], iteration_bounds = array<i64: 1>, scalar_prefetch = 0 : i64, scratch_operands = 0 : i64, tpu.core_type = #tpu.core_type<tc>, window_params = [{transform_indices = @transform_0, window_bounds = array<i64: 512, 80>}, {pipeline_mode = #tpu.pipeline_mode<synchronous>, transform_indices = @transform_1, window_bounds = array<i64: 80, 32>}, {pipeline_mode = #tpu.pipeline_mode<synchronous>, transform_indices = @transform_2, window_bounds = array<i64: 1, 32>}, {transform_indices = @transform_3, window_bounds = array<i64: 512, 32>}]} {
    %c0 = arith.constant 0 : index
    %c0_0 = arith.constant 0 : index
    %0 = vector.load %arg1[%c0, %c0_0] : memref<512x80xbf16, #tpu.memory_space<vmem>>, vector<512x80xbf16>
    %c0_1 = arith.constant 0 : index
    %c0_2 = arith.constant 0 : index
    %1 = vector.load %arg2[%c0_1, %c0_2] : memref<80x32xbf16, #tpu.memory_space<vmem>>, vector<80x32xbf16>
    %cst = arith.constant dense<0.000000e+00> : vector<512x32xf32>
    %2 = tpu.matmul %0, %1, %cst {dimension_numbers = #tpu.dot_dimension_numbers<[1], [0], [0], [1], [0, 0, 1, 1], [], []>} : vector<512x80xbf16>, vector<80x32xbf16>, vector<512x32xf32> -> vector<512x32xf32>
    %c0_3 = arith.constant 0 : index
    %c0_4 = arith.constant 0 : index
    %3 = vector.load %arg3[%c0_3, %c0_4] : memref<1x32xf32, #tpu.memory_space<vmem>>, vector<1x32xf32>
    %4 = vector.broadcast %3 : vector<1x32xf32> to vector<512x32xf32>
    %5 = arith.addf %2, %4 : vector<512x32xf32>
    %cst_5 = arith.constant 0.000000e+00 : f32
    %6 = vector.broadcast %cst_5 : f32 to vector<512x32xf32>
    %7 = arith.maximumf %5, %6 : vector<512x32xf32>
    %8 = arith.truncf %7 : vector<512x32xf32> to vector<512x32xbf16>
    %c0_6 = arith.constant 0 : index
    %c0_7 = arith.constant 0 : index
    %9 = vector.load %arg4[%c0_6, %c0_7] : memref<512x32xbf16, #tpu.memory_space<vmem>>, vector<512x32xbf16>
    tpu.vector_store %arg4[%c0_6, %c0_7], %8 {strides = array<i32>} : memref<512x32xbf16, #tpu.memory_space<vmem>>, vector<512x32xbf16>,
    return
  }
  func.func @transform_0(%arg0: i32) -> (i32, i32) {
    %c0_i32 = arith.constant 0 : i32
    %c0_i32_0 = arith.constant 0 : i32
    return %arg0, %c0_i32 : i32, i32
  }
  func.func @transform_1(%arg0: i32) -> (i32, i32) {
    %c0_i32 = arith.constant 0 : i32
    %c0_i32_0 = arith.constant 0 : i32
    %c0_i32_1 = arith.constant 0 : i32
    return %c0_i32, %c0_i32_0 : i32, i32
  }
  func.func @transform_2(%arg0: i32) -> (i32, i32) {
    %c0_i32 = arith.constant 0 : i32
    %c0_i32_0 = arith.constant 0 : i32
    %c0_i32_1 = arith.constant 0 : i32
    return %c0_i32, %c0_i32_0 : i32, i32
  }
  func.func @transform_3(%arg0: i32) -> (i32, i32) {
    %c0_i32 = arith.constant 0 : i32
    %c0_i32_0 = arith.constant 0 : i32
    return %arg0, %c0_i32 : i32, i32
  }
}

</mosaic_0001>

<bundles_post_ra>
// kernel: tpu_custom_call.1
= control target key start
LH: loop header
LB: loop body
LE: loop exit
PB: predicated region body
PF: predicated region fallthrough
CT: control target
= control target key end

     0   :  { %vm286_vm0 = vcmask 654336   ;;  %vm992_vm1 = vcmask 257024   ;;  %s1905_s1 = inlined_call_operand.vmem [shape: bf16[80,32], index: 1, kind: input, shape index: {}]   ;;  %s1906_s0 = inlined_call_operand.vmem [shape: bf16[512,80], index: 0, kind: input, shape index: {}]   ;;  %s1907_s2 = inlined_call_operand.vmem [shape: f32[1,32], index: 2, kind: input, shape index: {}]   ;;  %s1908_s3 = inlined_call_operand.vmem [shape: bf16[512,32], index: 3, kind: output, shape index: {}]  }
   0x1   :  { %v1380_v0 = vld [vmem:[%s1905_s1] sm:$0xff]   ;;  %v1381_v1 = vld [vmem:[%s1905_s1 + $0x8] sm:$0xff]   ;;  %v1382_v2 = vld [vmem:[%s1905_s1 + $0x10] sm:$0xff]  }
   0x2   :  { %1296 = vmatprep.subr.bf16.mxu0 %v1380_v0  ;;  %1370 = vmatprep.subr.bf16.mxu1 %v1380_v0  ;;  %v1385_v3 = vld [vmem:[%s1906_s0] sm:$0xff]   ;;  %v1383_v5 = vld [vmem:[%s1905_s1 + $0x18] sm:$0xff]   ;;  %v1387_v7 = vld [vmem:[%s1906_s0 + $0x8] sm:$0xff]  }
   0x3   :  { %1297 = vmatpush3.bf16.msra.mxu0 %v1380_v0  ;;  %1375 = vmatpush3.bf16.msra.mxu1 %v1380_v0  ;;  %v1386_v4 = vld [vmem:[%s1906_s0 + $0x80] sm:$0xff]   ;;  %v1388_v8 = vld [vmem:[%s1906_s0 + $0x88] sm:$0xff]   ;;  %v1389_v9 = vld [vmem:[%s1906_s0 + $0x10] sm:$0xff]  }
   0x4   :  { %1298 = vmatprep.subr.bf16.mxu0 %v1381_v1  ;;  %1371 = vmatprep.subr.bf16.mxu1 %v1381_v1  ;;  %v1384_v6 = vld [vmem:[%s1905_s1 + $0x20] sm:$0xff]   ;;  %v1390_v10 = vld [vmem:[%s1906_s0 + $0x90] sm:$0xff]   ;;  %v1391_v11 = vld [vmem:[%s1906_s0 + $0x18] sm:$0xff]  }
   0x5   :  { %1306 = vmatprep.mubr.msk.bf16.mxu0 %vm286_vm0, %v1385_v3  ;;  %1338 = vmatprep.mubr.msk.bf16.mxu1 %vm286_vm0, %v1386_v4  ;;  %v1392_v12 = vld [vmem:[%s1906_s0 + $0x98] sm:$0xff]   ;;  %v1393_v13 = vld [vmem:[%s1906_s0 + $0x20] sm:$0xff]   ;;  %v1395_v15 = vld [vmem:[%s1906_s0 + $0x28] sm:$0xff]  }
   0x6   :  { %v1394_v14 = vld [vmem:[%s1906_s0 + $0xa0] sm:$0xff]   ;;  %v1396_v16 = vld [vmem:[%s1906_s0 + $0xa8] sm:$0xff]   ;;  %v1397_v17 = vld [vmem:[%s1906_s0 + $0x30] sm:$0xff]  }
   0x7   :  { %1299 = vmatpush3.bf16.msra.mxu0 %v1381_v1  ;;  %1376 = vmatpush3.bf16.msra.mxu1 %v1381_v1  ;;  %v1398_v18 = vld [vmem:[%s1906_s0 + $0xb0] sm:$0xff]   ;;  %v1399_v19 = vld [vmem:[%s1906_s0 + $0x38] sm:$0xff]   ;;  %v1401_v21 = vld [vmem:[%s1906_s0 + $0x40] sm:$0xff]  }
   0x8   :  { %1300 = vmatprep.subr.bf16.mxu0 %v1382_v2  ;;  %1372 = vmatprep.subr.bf16.mxu1 %v1382_v2  ;;  %v1400_v20 = vld [vmem:[%s1906_s0 + $0xb8] sm:$0xff]   ;;  %v1402_v22 = vld [vmem:[%s1906_s0 + $0xc0] sm:$0xff]   ;;  %v1403_v23 = vld [vmem:[%s1906_s0 + $0x48] sm:$0xff]  }
   0x9   :  { %v1404_v24 = vld [vmem:[%s1906_s0 + $0xc8] sm:$0xff]   ;;  %v1405_v25 = vld [vmem:[%s1906_s0 + $0x50] sm:$0xff]   ;;  %v1407_v27 = vld [vmem:[%s1906_s0 + $0x58] sm:$0xff]  }
   0xa   :  { %v1406_v26 = vld [vmem:[%s1906_s0 + $0xd0] sm:$0xff]   ;;  %v1408_v28 = vld [vmem:[%s1906_s0 + $0xd8] sm:$0xff]   ;;  %v1409_v29 = vld [vmem:[%s1906_s0 + $0x60] sm:$0xff]  }
   0xb   :  { %1301 = vmatpush3.bf16.msra.mxu0 %v1382_v2  ;;  %1377 = vmatpush3.bf16.msra.mxu1 %v1382_v2  ;;  %v1410_v30 = vld [vmem:[%s1906_s0 + $0xe0] sm:$0xff]   ;;  %v1411_v31 = vld [vmem:[%s1906_s0 + $0x68] sm:$0xff]   ;;  %v1413_v33 = vld [vmem:[%s1906_s0 + $0x70] sm:$0xff]  }
   0xc   :  { %1302 = vmatprep.subr.bf16.mxu0 %v1383_v5  ;;  %1373 = vmatprep.subr.bf16.mxu1 %v1383_v5  ;;  %v1412_v32 = vld [vmem:[%s1906_s0 + $0xe8] sm:$0xff]   ;;  %v1414_v34 = vld [vmem:[%s1906_s0 + $0xf0] sm:$0xff]   ;;  %v1415_v35 = vld [vmem:[%s1906_s0 + $0x78] sm:$0xff]  }
   0xd   :  { %v1416_v36 = vld [vmem:[%s1906_s0 + $0xf8] sm:$0xff]   ;;  %v1583_v37 = vld [vmem:[%s1907_s2] ss:$0 sm:$0xff] }
   0xf   :  { %1303 = vmatpush3.bf16.msra.mxu0 %v1383_v5  ;;  %1378 = vmatpush3.bf16.msra.mxu1 %v1383_v5 }
  0x10   :  { %1304 = vmatprep.subr.bf16.mxu0 %v1384_v6  ;;  %1374 = vmatprep.subr.bf16.mxu1 %v1384_v6 }
  0x13   :  { %1305 = vmatpush3.bf16.msra.mxu0 %v1384_v6  ;;  %1379 = vmatpush3.bf16.msra.mxu1 %v1384_v6 }
  0x16   :  { %1307 = vmatmul.mubr.msk.bf16.vlgmr.msra.gmra.mrb[0].mxu0 %vm286_vm0, %v1387_v7  ;;  %1339 = vmatmul.mubr.msk.bf16.vlgmr.msra.gmra.mrb[0].mxu1 %vm286_vm0, %v1388_v8 }
  0x17   :  { %1310 = vmatprep.mubr.msk.bf16.mxu0 %vm286_vm0, %v1389_v9  ;;  %1342 = vmatprep.mubr.msk.bf16.mxu1 %vm286_vm0, %v1390_v10 }
  0x1e   :  { %1311 = vmatmul.mubr.msk.bf16.gmra.mrb[4].mxu0 %vm286_vm0, %v1391_v11  ;;  %1343 = vmatmul.mubr.msk.bf16.gmra.mrb[4].mxu1 %vm286_vm0, %v1392_v12 }
  0x1f   :  { %1314 = vmatprep.mubr.msk.bf16.mxu0 %vm286_vm0, %v1393_v13  ;;  %1346 = vmatprep.mubr.msk.bf16.mxu1 %vm286_vm0, %v1394_v14 }
  0x26   :  { %1315 = vmatmul.mubr.msk.bf16.gmra.mrb[8].mxu0 %vm286_vm0, %v1395_v15  ;;  %1347 = vmatmul.mubr.msk.bf16.gmra.mrb[8].mxu1 %vm286_vm0, %v1396_v16 }
  0x27   :  { %1318 = vmatprep.mubr.msk.bf16.mxu0 %vm286_vm0, %v1397_v17  ;;  %1350 = vmatprep.mubr.msk.bf16.mxu1 %vm286_vm0, %v1398_v18 }
  0x2e   :  { %1319 = vmatmul.mubr.msk.bf16.gmra.mrb[12].mxu0 %vm286_vm0, %v1399_v19  ;;  %1351 = vmatmul.mubr.msk.bf16.gmra.mrb[12].mxu1 %vm286_vm0, %v1400_v20 }
  0x2f   :  { %1322 = vmatprep.mubr.msk.bf16.mxu0 %vm286_vm0, %v1401_v21  ;;  %1354 = vmatprep.mubr.msk.bf16.mxu1 %vm286_vm0, %v1402_v22 }
  0x36   :  { %1323 = vmatmul.mubr.msk.bf16.gmra.mrb[16].mxu0 %vm286_vm0, %v1403_v23  ;;  %1355 = vmatmul.mubr.msk.bf16.gmra.mrb[16].mxu1 %vm286_vm0, %v1404_v24 }
  0x37   :  { %1326 = vmatprep.mubr.msk.bf16.mxu0 %vm286_vm0, %v1405_v25  ;;  %1358 = vmatprep.mubr.msk.bf16.mxu1 %vm286_vm0, %v1406_v26 }
  0x3e   :  { %1327 = vmatmul.mubr.msk.bf16.gmra.mrb[20].mxu0 %vm286_vm0, %v1407_v27  ;;  %1359 = vmatmul.mubr.msk.bf16.gmra.mrb[20].mxu1 %vm286_vm0, %v1408_v28 }
  0x3f   :  { %1330 = vmatprep.mubr.msk.bf16.mxu0 %vm286_vm0, %v1409_v29  ;;  %1362 = vmatprep.mubr.msk.bf16.mxu1 %vm286_vm0, %v1410_v30 }
  0x46   :  { %1331 = vmatmul.mubr.msk.bf16.gmra.mrb[24].mxu0 %vm286_vm0, %v1411_v31  ;;  %1363 = vmatmul.mubr.msk.bf16.gmra.mrb[24].mxu1 %vm286_vm0, %v1412_v32 }
  0x47   :  { %1334 = vmatprep.mubr.msk.bf16.mxu0 %vm286_vm0, %v1413_v33  ;;  %1366 = vmatprep.mubr.msk.bf16.mxu1 %vm286_vm0, %v1414_v34 }
  0x4e   :  { %1335 = vmatmul.mubr.msk.bf16.gmra.mrb[28].mxu0 %vm286_vm0, %v1415_v35  ;;  %1367 = vmatmul.mubr.msk.bf16.gmra.mrb[28].mxu1 %vm286_vm0, %v1416_v36 }
  0xe9   :  { %v1308_v38 = vpop.f32.mrb[0].mxu0  ;;  %v1340_v39 = vpop.f32.mrb[0].mxu1 }
  0xea   :  { %v426_v40 = vadd.f32 %v1308_v38, %v1583_v37  ;;  %v554_v41 = vadd.f32 %v1340_v39, %v1583_v37  ;;  %v417_v42 = vpop.f32.mrb[1].mxu0  ;;  %v545_v43 = vpop.f32.mrb[1].mxu1 }
  0xeb   :  { %v418_v44 = vadd.f32 %v1583_v37, %v417_v42  ;;  %v546_v45 = vadd.f32 %v1583_v37, %v545_v43  ;;  %v1309_v46 = vpop.f32.mrb[2].mxu0  ;;  %v1341_v47 = vpop.f32.mrb[2].mxu1 }
  0xec   :  { %v674_v48 = vmax.f32 %v426_v40, 0.0  ;;  %v706_v49 = vmax.f32 %v554_v41, 0.0  ;;  %v429_v50 = vadd.f32 %v1309_v46, %v1583_v37  ;;  %v557_v51 = vadd.f32 %v1341_v47, %v1583_v37  ;;  %v420_v52 = vpop.f32.mrb[3].mxu0  ;;  %v548_v53 = vpop.f32.mrb[3].mxu1 }
  0xed   :  { %v672_v54 = vmax.f32 %v418_v44, 0.0  ;;  %v704_v55 = vmax.f32 %v546_v45, 0.0  ;;  %v421_v56 = vadd.f32 %v1583_v37, %v420_v52  ;;  %v549_v57 = vadd.f32 %v1583_v37, %v548_v53 }
  0xee   :  { %v1197_v58 = vpack.c.bf16 %v674_v48, %v674_v48  ;;  %v1229_v59 = vpack.c.bf16 %v706_v49, %v706_v49  ;;  %v675_v60 = vmax.f32 %v429_v50, 0.0  ;;  %v707_v61 = vmax.f32 %v557_v51, 0.0 }
  0xef   :  { %v1195_v62 = vpack.c.bf16 %v672_v54, %v672_v54  ;;  %v1227_v63 = vpack.c.bf16 %v704_v55, %v704_v55  ;;  %v673_v0 = vmax.f32 %v421_v56, 0.0  ;;  %v705_v1 = vmax.f32 %v549_v57, 0.0 }
  0xf0   :  { %995 = vst.msk [vmem:[%s1908_s3 + $0x8] sm:$0xf] %vm992_vm1, %v1197_v58  ;;  %1027 = vst.msk [vmem:[%s1908_s3 + $0x88] sm:$0xf] %vm992_vm1, %v1229_v59  ;;  %v1198_v2 = vpack.c.bf16 %v675_v60, %v675_v60  ;;  %v1230_v3 = vpack.c.bf16 %v707_v61, %v707_v61 }
  0xf1   :  { %993 = vst.msk [vmem:[%s1908_s3] sm:$0xf] %vm992_vm1, %v1195_v62  ;;  %1025 = vst.msk [vmem:[%s1908_s3 + $0x80] sm:$0xf] %vm992_vm1, %v1227_v63  ;;  %v1196_v4 = vpack.c.bf16 %v673_v0, %v673_v0  ;;  %v1228_v5 = vpack.c.bf16 %v705_v1, %v705_v1  ;;  %v1312_v6 = vpop.f32.mrb[4].mxu0  ;;  %v1344_v7 = vpop.f32.mrb[4].mxu1 }
  0xf2   :  { %996 = vst.msk [vmem:[%s1908_s3 + $0xc] sm:$0xf] %vm992_vm1, %v1198_v2  ;;  %1028 = vst.msk [vmem:[%s1908_s3 + $0x8c] sm:$0xf] %vm992_vm1, %v1230_v3  ;;  %v442_v8 = vadd.f32 %v1312_v6, %v1583_v37  ;;  %v570_v9 = vadd.f32 %v1344_v7, %v1583_v37  ;;  %v433_v10 = vpop.f32.mrb[5].mxu0  ;;  %v561_v11 = vpop.f32.mrb[5].mxu1 }
  0xf3   :  { %994 = vst.msk [vmem:[%s1908_s3 + $0x4] sm:$0xf] %vm992_vm1, %v1196_v4  ;;  %1026 = vst.msk [vmem:[%s1908_s3 + $0x84] sm:$0xf] %vm992_vm1, %v1228_v5  ;;  %v434_v12 = vadd.f32 %v1583_v37, %v433_v10  ;;  %v562_v13 = vadd.f32 %v1583_v37, %v561_v11  ;;  %v1313_v14 = vpop.f32.mrb[6].mxu0  ;;  %v1345_v15 = vpop.f32.mrb[6].mxu1 }
  0xf4   :  { %v678_v16 = vmax.f32 %v442_v8, 0.0  ;;  %v710_v17 = vmax.f32 %v570_v9, 0.0  ;;  %v445_v18 = vadd.f32 %v1313_v14, %v1583_v37  ;;  %v573_v19 = vadd.f32 %v1345_v15, %v1583_v37  ;;  %v436_v20 = vpop.f32.mrb[7].mxu0  ;;  %v564_v21 = vpop.f32.mrb[7].mxu1 }
  0xf5   :  { %v676_v22 = vmax.f32 %v434_v12, 0.0  ;;  %v708_v23 = vmax.f32 %v562_v13, 0.0  ;;  %v437_v24 = vadd.f32 %v1583_v37, %v436_v20  ;;  %v565_v25 = vadd.f32 %v1583_v37, %v564_v21 }
  0xf6   :  { %v1201_v26 = vpack.c.bf16 %v678_v16, %v678_v16  ;;  %v1233_v27 = vpack.c.bf16 %v710_v17, %v710_v17  ;;  %v679_v28 = vmax.f32 %v445_v18, 0.0  ;;  %v711_v29 = vmax.f32 %v573_v19, 0.0 }
  0xf7   :  { %v1199_v30 = vpack.c.bf16 %v676_v22, %v676_v22  ;;  %v1231_v31 = vpack.c.bf16 %v708_v23, %v708_v23  ;;  %v677_v32 = vmax.f32 %v437_v24, 0.0  ;;  %v709_v33 = vmax.f32 %v565_v25, 0.0 }
  0xf8   :  { %999 = vst.msk [vmem:[%s1908_s3 + $0x18] sm:$0xf] %vm992_vm1, %v1201_v26  ;;  %1031 = vst.msk [vmem:[%s1908_s3 + $0x98] sm:$0xf] %vm992_vm1, %v1233_v27  ;;  %v1202_v34 = vpack.c.bf16 %v679_v28, %v679_v28  ;;  %v1234_v35 = vpack.c.bf16 %v711_v29, %v711_v29 }
  0xf9   :  { %997 = vst.msk [vmem:[%s1908_s3 + $0x10] sm:$0xf] %vm992_vm1, %v1199_v30  ;;  %1029 = vst.msk [vmem:[%s1908_s3 + $0x90] sm:$0xf] %vm992_vm1, %v1231_v31  ;;  %v1200_v36 = vpack.c.bf16 %v677_v32, %v677_v32  ;;  %v1232_v38 = vpack.c.bf16 %v709_v33, %v709_v33  ;;  %v1316_v39 = vpop.f32.mrb[8].mxu0  ;;  %v1348_v40 = vpop.f32.mrb[8].mxu1 }
  0xfa   :  { %1000 = vst.msk [vmem:[%s1908_s3 + $0x1c] sm:$0xf] %vm992_vm1, %v1202_v34  ;;  %1032 = vst.msk [vmem:[%s1908_s3 + $0x9c] sm:$0xf] %vm992_vm1, %v1234_v35  ;;  %v458_v41 = vadd.f32 %v1316_v39, %v1583_v37  ;;  %v586_v42 = vadd.f32 %v1348_v40, %v1583_v37  ;;  %v449_v43 = vpop.f32.mrb[9].mxu0  ;;  %v577_v44 = vpop.f32.mrb[9].mxu1 }
  0xfb   :  { %998 = vst.msk [vmem:[%s1908_s3 + $0x14] sm:$0xf] %vm992_vm1, %v1200_v36  ;;  %1030 = vst.msk [vmem:[%s1908_s3 + $0x94] sm:$0xf] %vm992_vm1, %v1232_v38  ;;  %v450_v45 = vadd.f32 %v1583_v37, %v449_v43  ;;  %v578_v46 = vadd.f32 %v1583_v37, %v577_v44  ;;  %v1317_v47 = vpop.f32.mrb[10].mxu0  ;;  %v1349_v48 = vpop.f32.mrb[10].mxu1 }
  0xfc   :  { %v682_v49 = vmax.f32 %v458_v41, 0.0  ;;  %v714_v50 = vmax.f32 %v586_v42, 0.0  ;;  %v461_v51 = vadd.f32 %v1317_v47, %v1583_v37  ;;  %v589_v52 = vadd.f32 %v1349_v48, %v1583_v37  ;;  %v452_v53 = vpop.f32.mrb[11].mxu0  ;;  %v580_v54 = vpop.f32.mrb[11].mxu1 }
  0xfd   :  { %v680_v55 = vmax.f32 %v450_v45, 0.0  ;;  %v712_v56 = vmax.f32 %v578_v46, 0.0  ;;  %v453_v57 = vadd.f32 %v1583_v37, %v452_v53  ;;  %v581_v58 = vadd.f32 %v1583_v37, %v580_v54 }
  0xfe   :  { %v1205_v59 = vpack.c.bf16 %v682_v49, %v682_v49  ;;  %v1237_v60 = vpack.c.bf16 %v714_v50, %v714_v50  ;;  %v683_v61 = vmax.f32 %v461_v51, 0.0  ;;  %v715_v62 = vmax.f32 %v589_v52, 0.0 }
  0xff   :  { %v1203_v63 = vpack.c.bf16 %v680_v55, %v680_v55  ;;  %v1235_v0 = vpack.c.bf16 %v712_v56, %v712_v56  ;;  %v681_v1 = vmax.f32 %v453_v57, 0.0  ;;  %v713_v2 = vmax.f32 %v581_v58, 0.0 }
 0x100   :  { %1003 = vst.msk [vmem:[%s1908_s3 + $0x28] sm:$0xf] %vm992_vm1, %v1205_v59  ;;  %1035 = vst.msk [vmem:[%s1908_s3 + $0xa8] sm:$0xf] %vm992_vm1, %v1237_v60  ;;  %v1206_v3 = vpack.c.bf16 %v683_v61, %v683_v61  ;;  %v1238_v4 = vpack.c.bf16 %v715_v62, %v715_v62 }
 0x101   :  { %1001 = vst.msk [vmem:[%s1908_s3 + $0x20] sm:$0xf] %vm992_vm1, %v1203_v63  ;;  %1033 = vst.msk [vmem:[%s1908_s3 + $0xa0] sm:$0xf] %vm992_vm1, %v1235_v0  ;;  %v1204_v5 = vpack.c.bf16 %v681_v1, %v681_v1  ;;  %v1236_v6 = vpack.c.bf16 %v713_v2, %v713_v2  ;;  %v1320_v7 = vpop.f32.mrb[12].mxu0  ;;  %v1352_v8 = vpop.f32.mrb[12].mxu1 }
 0x102   :  { %1004 = vst.msk [vmem:[%s1908_s3 + $0x2c] sm:$0xf] %vm992_vm1, %v1206_v3  ;;  %1036 = vst.msk [vmem:[%s1908_s3 + $0xac] sm:$0xf] %vm992_vm1, %v1238_v4  ;;  %v474_v9 = vadd.f32 %v1320_v7, %v1583_v37  ;;  %v602_v10 = vadd.f32 %v1352_v8, %v1583_v37  ;;  %v465_v11 = vpop.f32.mrb[13].mxu0  ;;  %v593_v12 = vpop.f32.mrb[13].mxu1 }
 0x103   :  { %1002 = vst.msk [vmem:[%s1908_s3 + $0x24] sm:$0xf] %vm992_vm1, %v1204_v5  ;;  %1034 = vst.msk [vmem:[%s1908_s3 + $0xa4] sm:$0xf] %vm992_vm1, %v1236_v6  ;;  %v466_v13 = vadd.f32 %v1583_v37, %v465_v11  ;;  %v594_v14 = vadd.f32 %v1583_v37, %v593_v12  ;;  %v1321_v15 = vpop.f32.mrb[14].mxu0  ;;  %v1353_v16 = vpop.f32.mrb[14].mxu1 }
 0x104   :  { %v686_v17 = vmax.f32 %v474_v9, 0.0  ;;  %v718_v18 = vmax.f32 %v602_v10, 0.0  ;;  %v477_v19 = vadd.f32 %v1321_v15, %v1583_v37  ;;  %v605_v20 = vadd.f32 %v1353_v16, %v1583_v37  ;;  %v468_v21 = vpop.f32.mrb[15].mxu0  ;;  %v596_v22 = vpop.f32.mrb[15].mxu1 }
 0x105   :  { %v684_v23 = vmax.f32 %v466_v13, 0.0  ;;  %v716_v24 = vmax.f32 %v594_v14, 0.0  ;;  %v469_v25 = vadd.f32 %v1583_v37, %v468_v21  ;;  %v597_v26 = vadd.f32 %v1583_v37, %v596_v22 }
 0x106   :  { %v1209_v27 = vpack.c.bf16 %v686_v17, %v686_v17  ;;  %v1241_v28 = vpack.c.bf16 %v718_v18, %v718_v18  ;;  %v687_v29 = vmax.f32 %v477_v19, 0.0  ;;  %v719_v30 = vmax.f32 %v605_v20, 0.0 }
 0x107   :  { %v1207_v31 = vpack.c.bf16 %v684_v23, %v684_v23  ;;  %v1239_v32 = vpack.c.bf16 %v716_v24, %v716_v24  ;;  %v685_v33 = vmax.f32 %v469_v25, 0.0  ;;  %v717_v34 = vmax.f32 %v597_v26, 0.0 }
 0x108   :  { %1007 = vst.msk [vmem:[%s1908_s3 + $0x38] sm:$0xf] %vm992_vm1, %v1209_v27  ;;  %1039 = vst.msk [vmem:[%s1908_s3 + $0xb8] sm:$0xf] %vm992_vm1, %v1241_v28  ;;  %v1210_v35 = vpack.c.bf16 %v687_v29, %v687_v29  ;;  %v1242_v36 = vpack.c.bf16 %v719_v30, %v719_v30 }
 0x109   :  { %1005 = vst.msk [vmem:[%s1908_s3 + $0x30] sm:$0xf] %vm992_vm1, %v1207_v31  ;;  %1037 = vst.msk [vmem:[%s1908_s3 + $0xb0] sm:$0xf] %vm992_vm1, %v1239_v32  ;;  %v1208_v38 = vpack.c.bf16 %v685_v33, %v685_v33  ;;  %v1240_v39 = vpack.c.bf16 %v717_v34, %v717_v34  ;;  %v1324_v40 = vpop.f32.mrb[16].mxu0  ;;  %v1356_v41 = vpop.f32.mrb[16].mxu1 }
 0x10a   :  { %1008 = vst.msk [vmem:[%s1908_s3 + $0x3c] sm:$0xf] %vm992_vm1, %v1210_v35  ;;  %1040 = vst.msk [vmem:[%s1908_s3 + $0xbc] sm:$0xf] %vm992_vm1, %v1242_v36  ;;  %v490_v42 = vadd.f32 %v1324_v40, %v1583_v37  ;;  %v618_v43 = vadd.f32 %v1356_v41, %v1583_v37  ;;  %v481_v44 = vpop.f32.mrb[17].mxu0  ;;  %v609_v45 = vpop.f32.mrb[17].mxu1 }
 0x10b   :  { %1006 = vst.msk [vmem:[%s1908_s3 + $0x34] sm:$0xf] %vm992_vm1, %v1208_v38  ;;  %1038 = vst.msk [vmem:[%s1908_s3 + $0xb4] sm:$0xf] %vm992_vm1, %v1240_v39  ;;  %v482_v46 = vadd.f32 %v1583_v37, %v481_v44  ;;  %v610_v47 = vadd.f32 %v1583_v37, %v609_v45  ;;  %v1325_v48 = vpop.f32.mrb[18].mxu0  ;;  %v1357_v49 = vpop.f32.mrb[18].mxu1 }
 0x10c   :  { %v690_v50 = vmax.f32 %v490_v42, 0.0  ;;  %v722_v51 = vmax.f32 %v618_v43, 0.0  ;;  %v493_v52 = vadd.f32 %v1325_v48, %v1583_v37  ;;  %v621_v53 = vadd.f32 %v1357_v49, %v1583_v37  ;;  %v484_v54 = vpop.f32.mrb[19].mxu0  ;;  %v612_v55 = vpop.f32.mrb[19].mxu1 }
 0x10d   :  { %v688_v56 = vmax.f32 %v482_v46, 0.0  ;;  %v720_v57 = vmax.f32 %v610_v47, 0.0  ;;  %v485_v58 = vadd.f32 %v1583_v37, %v484_v54  ;;  %v613_v59 = vadd.f32 %v1583_v37, %v612_v55 }
 0x10e   :  { %v1213_v60 = vpack.c.bf16 %v690_v50, %v690_v50  ;;  %v1245_v61 = vpack.c.bf16 %v722_v51, %v722_v51  ;;  %v691_v62 = vmax.f32 %v493_v52, 0.0  ;;  %v723_v63 = vmax.f32 %v621_v53, 0.0 }
 0x10f   :  { %v1211_v0 = vpack.c.bf16 %v688_v56, %v688_v56  ;;  %v1243_v1 = vpack.c.bf16 %v720_v57, %v720_v57  ;;  %v689_v2 = vmax.f32 %v485_v58, 0.0  ;;  %v721_v3 = vmax.f32 %v613_v59, 0.0 }
 0x110   :  { %1011 = vst.msk [vmem:[%s1908_s3 + $0x48] sm:$0xf] %vm992_vm1, %v1213_v60  ;;  %1043 = vst.msk [vmem:[%s1908_s3 + $0xc8] sm:$0xf] %vm992_vm1, %v1245_v61  ;;  %v1214_v4 = vpack.c.bf16 %v691_v62, %v691_v62  ;;  %v1246_v5 = vpack.c.bf16 %v723_v63, %v723_v63 }
 0x111   :  { %1009 = vst.msk [vmem:[%s1908_s3 + $0x40] sm:$0xf] %vm992_vm1, %v1211_v0  ;;  %1041 = vst.msk [vmem:[%s1908_s3 + $0xc0] sm:$0xf] %vm992_vm1, %v1243_v1  ;;  %v1212_v6 = vpack.c.bf16 %v689_v2, %v689_v2  ;;  %v1244_v7 = vpack.c.bf16 %v721_v3, %v721_v3  ;;  %v1328_v8 = vpop.f32.mrb[20].mxu0  ;;  %v1360_v9 = vpop.f32.mrb[20].mxu1 }
 0x112   :  { %1012 = vst.msk [vmem:[%s1908_s3 + $0x4c] sm:$0xf] %vm992_vm1, %v1214_v4  ;;  %1044 = vst.msk [vmem:[%s1908_s3 + $0xcc] sm:$0xf] %vm992_vm1, %v1246_v5  ;;  %v506_v10 = vadd.f32 %v1328_v8, %v1583_v37  ;;  %v634_v11 = vadd.f32 %v1360_v9, %v1583_v37  ;;  %v497_v12 = vpop.f32.mrb[21].mxu0  ;;  %v625_v13 = vpop.f32.mrb[21].mxu1 }
 0x113   :  { %1010 = vst.msk [vmem:[%s1908_s3 + $0x44] sm:$0xf] %vm992_vm1, %v1212_v6  ;;  %1042 = vst.msk [vmem:[%s1908_s3 + $0xc4] sm:$0xf] %vm992_vm1, %v1244_v7  ;;  %v498_v14 = vadd.f32 %v1583_v37, %v497_v12  ;;  %v626_v15 = vadd.f32 %v1583_v37, %v625_v13  ;;  %v1329_v16 = vpop.f32.mrb[22].mxu0  ;;  %v1361_v17 = vpop.f32.mrb[22].mxu1 }
 0x114   :  { %v694_v18 = vmax.f32 %v506_v10, 0.0  ;;  %v726_v19 = vmax.f32 %v634_v11, 0.0  ;;  %v509_v20 = vadd.f32 %v1329_v16, %v1583_v37  ;;  %v637_v21 = vadd.f32 %v1361_v17, %v1583_v37  ;;  %v500_v22 = vpop.f32.mrb[23].mxu0  ;;  %v628_v23 = vpop.f32.mrb[23].mxu1 }
 0x115   :  { %v692_v24 = vmax.f32 %v498_v14, 0.0  ;;  %v724_v25 = vmax.f32 %v626_v15, 0.0  ;;  %v501_v26 = vadd.f32 %v1583_v37, %v500_v22  ;;  %v629_v27 = vadd.f32 %v1583_v37, %v628_v23 }
 0x116   :  { %v1217_v28 = vpack.c.bf16 %v694_v18, %v694_v18  ;;  %v1249_v29 = vpack.c.bf16 %v726_v19, %v726_v19  ;;  %v695_v30 = vmax.f32 %v509_v20, 0.0  ;;  %v727_v31 = vmax.f32 %v637_v21, 0.0 }
 0x117   :  { %v1215_v32 = vpack.c.bf16 %v692_v24, %v692_v24  ;;  %v1247_v33 = vpack.c.bf16 %v724_v25, %v724_v25  ;;  %v693_v34 = vmax.f32 %v501_v26, 0.0  ;;  %v725_v35 = vmax.f32 %v629_v27, 0.0 }
 0x118   :  { %1015 = vst.msk [vmem:[%s1908_s3 + $0x58] sm:$0xf] %vm992_vm1, %v1217_v28  ;;  %1047 = vst.msk [vmem:[%s1908_s3 + $0xd8] sm:$0xf] %vm992_vm1, %v1249_v29  ;;  %v1218_v36 = vpack.c.bf16 %v695_v30, %v695_v30  ;;  %v1250_v38 = vpack.c.bf16 %v727_v31, %v727_v31 }
 0x119   :  { %1013 = vst.msk [vmem:[%s1908_s3 + $0x50] sm:$0xf] %vm992_vm1, %v1215_v32  ;;  %1045 = vst.msk [vmem:[%s1908_s3 + $0xd0] sm:$0xf] %vm992_vm1, %v1247_v33  ;;  %v1216_v39 = vpack.c.bf16 %v693_v34, %v693_v34  ;;  %v1248_v40 = vpack.c.bf16 %v725_v35, %v725_v35  ;;  %v1332_v41 = vpop.f32.mrb[24].mxu0  ;;  %v1364_v42 = vpop.f32.mrb[24].mxu1 }
 0x11a   :  { %1016 = vst.msk [vmem:[%s1908_s3 + $0x5c] sm:$0xf] %vm992_vm1, %v1218_v36  ;;  %1048 = vst.msk [vmem:[%s1908_s3 + $0xdc] sm:$0xf] %vm992_vm1, %v1250_v38  ;;  %v522_v43 = vadd.f32 %v1332_v41, %v1583_v37  ;;  %v650_v44 = vadd.f32 %v1364_v42, %v1583_v37  ;;  %v513_v45 = vpop.f32.mrb[25].mxu0  ;;  %v641_v46 = vpop.f32.mrb[25].mxu1 }
 0x11b   :  { %1014 = vst.msk [vmem:[%s1908_s3 + $0x54] sm:$0xf] %vm992_vm1, %v1216_v39  ;;  %1046 = vst.msk [vmem:[%s1908_s3 + $0xd4] sm:$0xf] %vm992_vm1, %v1248_v40  ;;  %v514_v47 = vadd.f32 %v1583_v37, %v513_v45  ;;  %v642_v48 = vadd.f32 %v1583_v37, %v641_v46  ;;  %v1333_v49 = vpop.f32.mrb[26].mxu0  ;;  %v1365_v50 = vpop.f32.mrb[26].mxu1 }
 0x11c   :  { %v698_v51 = vmax.f32 %v522_v43, 0.0  ;;  %v730_v52 = vmax.f32 %v650_v44, 0.0  ;;  %v525_v53 = vadd.f32 %v1333_v49, %v1583_v37  ;;  %v653_v54 = vadd.f32 %v1365_v50, %v1583_v37  ;;  %v516_v55 = vpop.f32.mrb[27].mxu0  ;;  %v644_v56 = vpop.f32.mrb[27].mxu1 }
 0x11d   :  { %v696_v57 = vmax.f32 %v514_v47, 0.0  ;;  %v728_v58 = vmax.f32 %v642_v48, 0.0  ;;  %v517_v59 = vadd.f32 %v1583_v37, %v516_v55  ;;  %v645_v60 = vadd.f32 %v1583_v37, %v644_v56 }
 0x11e   :  { %v1221_v61 = vpack.c.bf16 %v698_v51, %v698_v51  ;;  %v1253_v62 = vpack.c.bf16 %v730_v52, %v730_v52  ;;  %v699_v63 = vmax.f32 %v525_v53, 0.0  ;;  %v731_v0 = vmax.f32 %v653_v54, 0.0 }
 0x11f   :  { %v1219_v1 = vpack.c.bf16 %v696_v57, %v696_v57  ;;  %v1251_v2 = vpack.c.bf16 %v728_v58, %v728_v58  ;;  %v697_v3 = vmax.f32 %v517_v59, 0.0  ;;  %v729_v4 = vmax.f32 %v645_v60, 0.0 }
 0x120   :  { %1019 = vst.msk [vmem:[%s1908_s3 + $0x68] sm:$0xf] %vm992_vm1, %v1221_v61  ;;  %1051 = vst.msk [vmem:[%s1908_s3 + $0xe8] sm:$0xf] %vm992_vm1, %v1253_v62  ;;  %v1222_v5 = vpack.c.bf16 %v699_v63, %v699_v63  ;;  %v1254_v6 = vpack.c.bf16 %v731_v0, %v731_v0 }
 0x121   :  { %1017 = vst.msk [vmem:[%s1908_s3 + $0x60] sm:$0xf] %vm992_vm1, %v1219_v1  ;;  %1049 = vst.msk [vmem:[%s1908_s3 + $0xe0] sm:$0xf] %vm992_vm1, %v1251_v2  ;;  %v1220_v7 = vpack.c.bf16 %v697_v3, %v697_v3  ;;  %v1252_v8 = vpack.c.bf16 %v729_v4, %v729_v4  ;;  %v1336_v9 = vpop.f32.mrb[28].mxu0  ;;  %v1368_v10 = vpop.f32.mrb[28].mxu1 }
 0x122   :  { %1020 = vst.msk [vmem:[%s1908_s3 + $0x6c] sm:$0xf] %vm992_vm1, %v1222_v5  ;;  %1052 = vst.msk [vmem:[%s1908_s3 + $0xec] sm:$0xf] %vm992_vm1, %v1254_v6  ;;  %v538_v11 = vadd.f32 %v1336_v9, %v1583_v37  ;;  %v666_v12 = vadd.f32 %v1368_v10, %v1583_v37  ;;  %v529_v13 = vpop.f32.mrb[29].mxu0  ;;  %v657_v14 = vpop.f32.mrb[29].mxu1 }
 0x123   :  { %1018 = vst.msk [vmem:[%s1908_s3 + $0x64] sm:$0xf] %vm992_vm1, %v1220_v7  ;;  %1050 = vst.msk [vmem:[%s1908_s3 + $0xe4] sm:$0xf] %vm992_vm1, %v1252_v8  ;;  %v530_v15 = vadd.f32 %v1583_v37, %v529_v13  ;;  %v658_v16 = vadd.f32 %v1583_v37, %v657_v14  ;;  %v1337_v17 = vpop.f32.mrb[30].mxu0  ;;  %v1369_v18 = vpop.f32.mrb[30].mxu1 }
 0x124   :  { %v702_v19 = vmax.f32 %v538_v11, 0.0  ;;  %v734_v20 = vmax.f32 %v666_v12, 0.0  ;;  %v541_v21 = vadd.f32 %v1337_v17, %v1583_v37  ;;  %v669_v22 = vadd.f32 %v1369_v18, %v1583_v37  ;;  %v532_v23 = vpop.f32.mrb[31].mxu0  ;;  %v660_v24 = vpop.f32.mrb[31].mxu1 }
 0x125   :  { %v700_v25 = vmax.f32 %v530_v15, 0.0  ;;  %v732_v26 = vmax.f32 %v658_v16, 0.0  ;;  %v533_v27 = vadd.f32 %v1583_v37, %v532_v23  ;;  %v661_v28 = vadd.f32 %v1583_v37, %v660_v24 }
 0x126   :  { %v1225_v29 = vpack.c.bf16 %v702_v19, %v702_v19  ;;  %v1257_v30 = vpack.c.bf16 %v734_v20, %v734_v20  ;;  %v703_v31 = vmax.f32 %v541_v21, 0.0  ;;  %v735_v32 = vmax.f32 %v669_v22, 0.0 }
 0x127   :  { %v1223_v33 = vpack.c.bf16 %v700_v25, %v700_v25  ;;  %v1255_v34 = vpack.c.bf16 %v732_v26, %v732_v26  ;;  %v701_v35 = vmax.f32 %v533_v27, 0.0  ;;  %v733_v36 = vmax.f32 %v661_v28, 0.0 }
 0x128   :  { %1023 = vst.msk [vmem:[%s1908_s3 + $0x78] sm:$0xf] %vm992_vm1, %v1225_v29  ;;  %1055 = vst.msk [vmem:[%s1908_s3 + $0xf8] sm:$0xf] %vm992_vm1, %v1257_v30  ;;  %v1226_v38 = vpack.c.bf16 %v703_v31, %v703_v31  ;;  %v1258_v37 = vpack.c.bf16 %v735_v32, %v735_v32 }
 0x129   :  { %1021 = vst.msk [vmem:[%s1908_s3 + $0x70] sm:$0xf] %vm992_vm1, %v1223_v33  ;;  %1053 = vst.msk [vmem:[%s1908_s3 + $0xf0] sm:$0xf] %vm992_vm1, %v1255_v34  ;;  %v1224_v39 = vpack.c.bf16 %v701_v35, %v701_v35  ;;  %v1256_v40 = vpack.c.bf16 %v733_v36, %v733_v36 }
 0x12a   :  { %1024 = vst.msk [vmem:[%s1908_s3 + $0x7c] sm:$0xf] %vm992_vm1, %v1226_v38  ;;  %1056 = vst.msk [vmem:[%s1908_s3 + $0xfc] sm:$0xf] %vm992_vm1, %v1258_v37 }
 0x12b   :  { %1022 = vst.msk [vmem:[%s1908_s3 + $0x74] sm:$0xf] %vm992_vm1, %v1224_v39  ;;  %1054 = vst.msk [vmem:[%s1908_s3 + $0xf4] sm:$0xf] %vm992_vm1, %v1256_v40 }

</bundles_post_ra>
